<compile_context>
chip_gen: v7x
topology: tpu7x:2x2x1
jax: 0.10.0
libtpu: 0.0.40
codegen_flags: <defaults>
</compile_context>

<pallas_src>
import math
import functools

import jax
import jax.numpy as jnp
from jax import lax
from jax.experimental import pallas as pl
from jax.experimental.pallas import tpu as pltpu

LANES = 128  # TPU lane count -> last dim of every tile

_INV_SQRT_PI = 1.0 / math.sqrt(math.pi)
_INV_SQRT_2 = 1.0 / math.sqrt(2.0)
_SQRT_2_OVER_PI = math.sqrt(2.0 / math.pi)


def _cdiv(a, b):
    return (a + b - 1) // b


def _round_up(a, b):
    return _cdiv(a, b) * b


def _device_tuning():
    """Return (max_block_rows, num_splits) for the current TPU generation."""
    try:
        kind = jax.devices()[0].device_kind.lower()
    except Exception:  # pragma: no cover - no device / CPU fallback
        kind = ""
    if "v7" in kind:
        # 2 TensorCores per chip; 32 MiB default scoped VMEM / 64 MiB physical.
        return 4096, 2
    if "v6" in kind:
        # 1 TC; 32 MiB default scoped VMEM.
        return 4096, 1
    # v5e / older / unknown: stay well inside the 16 MiB default scoped VMEM.
    return 2048, 1


def _crps_score(obs, mu, sig, sigma_transform):
    """Elementwise CRPS of N(mu, std) against obs (f32 inputs)."""
    if sigma_transform == "softplus":
        std = jax.nn.softplus(sig)
        inv_std = pl.reciprocal(std, approx=True)   # EUP slot, ~1e-3 rel err
    elif sigma_transform == "exp":
        std = jnp.exp(sig)
        inv_std = jnp.exp(-sig)                     # exact, same EUP cost
    elif sigma_transform == "none":
        std = sig
        inv_std = pl.reciprocal(std, approx=True)
    else:
        raise NotImplementedError(
            f"Sigma transform {sigma_transform} not implemented")

    z = (obs - mu) * inv_std
    w = z * _INV_SQRT_2                 # reused for erf(w) and exp(-w*w)
    g = jnp.exp(-(w * w))               # == exp(-z^2/2)
    # 2*phi = sqrt(2/pi) * exp(-z^2/2) ; constants folded into multiplies.
    return std * (z * lax.erf(w) + _SQRT_2_OVER_PI * g - _INV_SQRT_PI)


def _crps_reduce_kernel(obs_ref, mu_ref, sig_ref, out_ref, acc_ref, *,
                        sigma_transform, full_rows, rem, block_rows,
                        steps_per_split):
    """Masked running sum of CRPS scores into a tile-shaped VMEM accumulator."""
    c = pl.program_id(0)   # "parallel" split (TensorCore shard on v7x)
    i = pl.program_id(1)   # "arbitrary" reduction axis

    @pl.when(i == 0)
    def _init():
        acc_ref[...] = jnp.zeros_like(acc_ref)

    score = _crps_score(obs_ref[...].astype(jnp.float32),
                        mu_ref[...].astype(jnp.float32),
                        sig_ref[...].astype(jnp.float32),
                        sigma_transform)

    # Logical tile position in ROWS (not flat elements -> no int32 overflow for
    # any input below ~2^31 * 128 elements).  If the split axis rounded the
    # grid up, this tile's logical rows lie past the data and the mask below
    # zeroes everything (its DMA was clamped to re-read the last real tile).
    row0 = (c * steps_per_split + i) * block_rows
    is_full_tile = row0 + block_rows <= full_rows

    @pl.when(is_full_tile)
    def _fast_path():
        # Hot path: a single pipelined VPU add, no masking work.
        acc_ref[...] += score

    @pl.when(jnp.logical_not(is_full_tile))
    def _masked_path():
        rows_, cols_ = score.shape
        grow = row0 + lax.broadcasted_iota(jnp.int32, (rows_, cols_), 0)
        mask = grow < full_rows
        if rem:
            col = lax.broadcasted_iota(jnp.int32, (rows_, cols_), 1)
            mask = jnp.logical_or(mask,
                                  jnp.logical_and(grow == full_rows,
                                                  col < rem))
        # select: NaN/inf scores from padded / stale rows never propagate.
        acc_ref[...] += jnp.where(mask, score, 0.0)

    @pl.when(i == pl.num_programs(1) - 1)
    def _finalize():
        # Fold (block_rows, 128) -> (8, 128) with 8 interleaved partial
        # accumulators (short dependence chains) + a small combine tree.
        # One (8,128) vreg-sized slice is live per add; no big reshape/spill.
        num_slices = block_rows // 8
        n_par = min(8, num_slices)
        parts = [acc_ref[j * 8:(j + 1) * 8, :] for j in range(n_par)]
        for r in range(n_par, num_slices):
            parts[r % n_par] = parts[r % n_par] + acc_ref[r * 8:(r + 1) * 8, :]
        while len(parts) > 1:
            nxt = [parts[k] + parts[k + 1]
                   for k in range(0, len(parts) - 1, 2)]
            if len(parts) % 2:
                nxt.append(parts[-1])
            parts = nxt
        out_ref[0] = parts[0]


def _crps_elem_kernel(obs_ref, mu_ref, sig_ref, out_ref, *, sigma_transform):
    """Elementwise CRPS score (reduction='none')."""
    out_ref[...] = _crps_score(
        obs_ref[...].astype(jnp.float32),
        mu_ref[...].astype(jnp.float32),
        sig_ref[...].astype(jnp.float32),
        sigma_transform,
    ).astype(out_ref.dtype)


def _as_rows(x, total_rows):
    """Flatten to (total_rows, LANES); pad (copy) only when strictly needed."""
    flat = x.reshape(-1)
    pad = total_rows * LANES - flat.shape[0]
    if pad:
        flat = jnp.pad(flat, (0, pad))
    return flat.reshape(total_rows, LANES)


@functools.partial(jax.jit, static_argnames=("reduction", "sigma_transform"))
def normal_crps(observation, mu, sigma, *, reduction="mean",
                sigma_transform="softplus"):
    """JAX/Pallas equivalent of NormalCRPS(reduction, sigma_transform).forward."""
    assert observation.shape == mu.shape == sigma.shape
    orig_shape = observation.shape
    n = int(observation.size)
    out_dtype = jnp.result_type(observation.dtype, mu.dtype, sigma.dtype)

    max_block_rows, num_splits_pref = _device_tuning()
    rows = max(_cdiv(n, LANES), 1)

    if reduction in ("mean", "sum"):
        # Pad only to a single 8x128 stripe (<=1023 elems); zero-copy when the
        # flat size is already a multiple of 1024.
        total_rows = _round_up(rows, 8)
        block_rows = min(max_block_rows, total_rows)   # multiple of 8
        steps = _cdiv(total_rows, block_rows)
        num_splits = max(1, min(num_splits_pref, steps))
        steps_per_split = _cdiv(steps, num_splits)

        obs2d = _as_rows(observation, total_rows)
        mu2d = _as_rows(mu, total_rows)
        sig2d = _as_rows(sigma, total_rows)

        kernel = functools.partial(
            _crps_reduce_kernel, sigma_transform=sigma_transform,
            full_rows=n // LANES, rem=n % LANES,
            block_rows=block_rows, steps_per_split=steps_per_split)

        def row_block(c, i):
            # Clamp tiles past the last real one (only when the split axis
            # rounds the grid up); their contribution is masked to zero.
            t = c * steps_per_split + i
            return (jnp.minimum(t, steps - 1), 0)

        partials = pl.pallas_call(
            kernel,
            out_shape=jax.ShapeDtypeStruct((num_splits, 8, LANES),
                                           jnp.float32),
            grid_spec=pltpu.PrefetchScalarGridSpec(
                num_scalar_prefetch=0,
                grid=(num_splits, steps_per_split),
                in_specs=[
                    pl.BlockSpec((block_rows, LANES), row_block),
                    pl.BlockSpec((block_rows, LANES), row_block),
                    pl.BlockSpec((block_rows, LANES), row_block),
                ],
                out_specs=pl.BlockSpec((1, 8, LANES), lambda c, i: (c, 0, 0)),
                scratch_shapes=[pltpu.VMEM((block_rows, LANES), jnp.float32)],
            ),
            compiler_params=pltpu.CompilerParams(
                dimension_semantics=("parallel", "arbitrary")),
        )(obs2d, mu2d, sig2d)

        total = jnp.sum(partials)
        if reduction == "mean":
            total = total / n
        return total.astype(out_dtype)

    elif reduction == "none":
        # Output path: keep the grid dividing evenly so every output block is
        # fully written; padding is zero-copy for aligned sizes and bounded by
        # one block otherwise.
        if rows <= max_block_rows:
            block_rows = rows          # full-dim block (8-divisibility waived)
            total_rows = rows
        else:
            block_rows = max_block_rows
            total_rows = _round_up(rows, max_block_rows)
        steps = total_rows // block_rows

        obs2d = _as_rows(observation, total_rows)
        mu2d = _as_rows(mu, total_rows)
        sig2d = _as_rows(sigma, total_rows)

        kernel = functools.partial(_crps_elem_kernel,
                                   sigma_transform=sigma_transform)
        score2d = pl.pallas_call(
            kernel,
            out_shape=jax.ShapeDtypeStruct((total_rows, LANES), out_dtype),
            grid_spec=pltpu.PrefetchScalarGridSpec(
                num_scalar_prefetch=0,
                grid=(steps,),
                in_specs=[
                    pl.BlockSpec((block_rows, LANES), lambda i: (i, 0)),
                    pl.BlockSpec((block_rows, LANES), lambda i: (i, 0)),
                    pl.BlockSpec((block_rows, LANES), lambda i: (i, 0)),
                ],
                out_specs=pl.BlockSpec((block_rows, LANES), lambda i: (i, 0)),
            ),
            compiler_params=pltpu.CompilerParams(
                dimension_semantics=("parallel",)),
        )(obs2d, mu2d, sig2d)

        out = score2d.reshape(-1)
        if total_rows * LANES != n:
            out = out[:n]
        return out.reshape(orig_shape)

    else:
        raise NotImplementedError(f"Reduction {reduction} not implemented")


def _reference_crps(observation, mu, sigma, reduction="mean",
                    sigma_transform="softplus"):
    """Pure-JAX reference mirroring the PyTorch module exactly."""
    if sigma_transform == "softplus":
        std = jax.nn.softplus(sigma)
    elif sigma_transform == "exp":
        std = jnp.exp(sigma)
    else:
        std = sigma
    z = (observation - mu) / std
    phi = jnp.exp(-z ** 2 / 2) / (math.sqrt(2.0) * math.sqrt(math.pi))
    score = std * (z * lax.erf(z / math.sqrt(2.0)) + 2 * phi
                   - 1 / math.sqrt(math.pi))
    if reduction == "mean":
        return score.mean()
    if reduction == "sum":
        return score.sum()
    return score


if __name__ == "__main__":
    key = jax.random.PRNGKey(0)
    k1, k2, k3 = jax.random.split(key, 3)

    # (batch, channels, H, W) observations / means / raw-sigma.
    shape = (2, 4, 16, 16)
    observation = jax.random.normal(k1, shape, dtype=jnp.float32)
    mu = jax.random.normal(k2, shape, dtype=jnp.float32)
    sigma = jax.random.normal(k3, shape, dtype=jnp.float32)  # pre-transform

    # reduction='mean', softplus transform (module defaults)
    out_mean = jax.block_until_ready(
        normal_crps(observation, mu, sigma,
                    reduction="mean", sigma_transform="softplus"))
    ref_mean = _reference_crps(observation, mu, sigma, "mean", "softplus")
    assert jnp.allclose(out_mean, ref_mean, rtol=5e-3, atol=1e-4), \
        (out_mean, ref_mean)

    # reduction='none'
    out_none = jax.block_until_ready(
        normal_crps(observation, mu, sigma,
                    reduction="none", sigma_transform="softplus"))
    ref_none = _reference_crps(observation, mu, sigma, "none", "softplus")
    assert out_none.shape == shape
    assert jnp.allclose(out_none, ref_none, rtol=5e-3, atol=2e-3), \
        float(jnp.abs(out_none - ref_none).max())

    # reduction='sum', exp transform
    out_sum = jax.block_until_ready(
        normal_crps(observation, mu, sigma,
                    reduction="sum", sigma_transform="exp"))
    ref_sum = _reference_crps(observation, mu, sigma, "sum", "exp")
    assert jnp.allclose(out_sum, ref_sum, rtol=5e-3, atol=1e-2), \
        (out_sum, ref_sum)

    # Misaligned size (105 elements) + sigma_transform='none':
    # exercises the masked tail, the minimal padding path and the
    # padded-element inf/NaN containment flagged in review.
    shape2 = (3, 5, 7)
    o2 = jax.random.normal(k1, shape2, dtype=jnp.float32)
    m2 = jax.random.normal(k2, shape2, dtype=jnp.float32)
    s2 = jnp.abs(jax.random.normal(k3, shape2, dtype=jnp.float32)) + 0.5
    out2 = jax.block_until_ready(
        normal_crps(o2, m2, s2, reduction="mean", sigma_transform="none"))
    ref2 = _reference_crps(o2, m2, s2, "mean", "none")
    assert jnp.isfinite(out2)
    assert jnp.allclose(out2, ref2, rtol=1e-2, atol=2e-3), (out2, ref2)

    out2n = jax.block_until_ready(
        normal_crps(o2, m2, s2, reduction="none", sigma_transform="none"))
    ref2n = _reference_crps(o2, m2, s2, "none", "none")
    assert out2n.shape == shape2
    assert jnp.allclose(out2n, ref2n, rtol=1e-2, atol=3e-3), \
        float(jnp.abs(out2n - ref2n).max())

    print("KERNEL_OK")
</pallas_src>

<mosaic_0001>
module attributes {stable_mosaic.version = 11 : i64} {
  func.func @_crps_reduce_kernel(%arg0: i32, %arg1: i32, %arg2: memref<16x128xf32, #tpu.memory_space<vmem>>, %arg3: memref<16x128xf32, #tpu.memory_space<vmem>>, %arg4: memref<16x128xf32, #tpu.memory_space<vmem>>, %arg5: memref<1x8x128xf32, #tpu.memory_space<vmem>>, %arg6: memref<16x128xf32, #tpu.memory_space<vmem>>) attributes {dimension_semantics = [#tpu.dimension_semantics<parallel>, #tpu.dimension_semantics<arbitrary>], iteration_bounds = array<i64: 1, 1>, scalar_prefetch = 0 : i64, scratch_operands = 1 : i64, tpu.core_type = #tpu.core_type<tc>, window_params = [{transform_indices = @transform_0, window_bounds = array<i64: 16, 128>}, {transform_indices = @transform_1, window_bounds = array<i64: 16, 128>}, {transform_indices = @transform_2, window_bounds = array<i64: 16, 128>}, {transform_indices = @transform_3, window_bounds = array<i64: 1, 8, 128>}]} {
    %c0_i32 = arith.constant 0 : i32
    %0 = arith.cmpi eq, %arg1, %c0_i32 : i32
    %1 = arith.extui %0 : i1 to i32
    %c0_i32_0 = arith.constant 0 : i32
    %2 = arith.cmpi ne, %1, %c0_i32_0 : i32
    scf.if %2 {
      %cst_17 = arith.constant 0.000000e+00 : f32
      %50 = vector.broadcast %cst_17 : f32 to vector<16x128xf32>
      %c0_18 = arith.constant 0 : index
      %c0_19 = arith.constant 0 : index
      %51 = vector.load %arg6[%c0_18, %c0_19] : memref<16x128xf32, #tpu.memory_space<vmem>>, vector<16x128xf32>
      tpu.vector_store %arg6[%c0_18, %c0_19], %50 {strides = array<i32>} : memref<16x128xf32, #tpu.memory_space<vmem>>, vector<16x128xf32>,
    } else {
    }
    %c0 = arith.constant 0 : index
    %c0_1 = arith.constant 0 : index
    %3 = vector.load %arg2[%c0, %c0_1] : memref<16x128xf32, #tpu.memory_space<vmem>>, vector<16x128xf32>
    %c0_2 = arith.constant 0 : index
    %c0_3 = arith.constant 0 : index
    %4 = vector.load %arg3[%c0_2, %c0_3] : memref<16x128xf32, #tpu.memory_space<vmem>>, vector<16x128xf32>
    %c0_4 = arith.constant 0 : index
    %c0_5 = arith.constant 0 : index
    %5 = vector.load %arg4[%c0_4, %c0_5] : memref<16x128xf32, #tpu.memory_space<vmem>>, vector<16x128xf32>
    %cst = arith.constant 0.000000e+00 : f32
    %6 = vector.broadcast %cst : f32 to vector<16x128xf32>
    %7 = arith.maximumf %5, %6 : vector<16x128xf32>
    %8 = vector.broadcast %cst : f32 to vector<16x128xf32>
    %9 = arith.subf %5, %8 : vector<16x128xf32>
    %10 = arith.cmpf one, %9, %9 : vector<16x128xf32>
    %11 = vector.broadcast %cst : f32 to vector<16x128xf32>
    %12 = arith.addf %5, %11 : vector<16x128xf32>
    %13 = math.absf %9 : vector<16x128xf32>
    %cst_6 = arith.constant 0.000000e+00 : f32
    %14 = vector.broadcast %cst_6 : f32 to vector<16x128xf32>
    %15 = arith.subf %14, %13 : vector<16x128xf32>
    %16 = math.exp %15 : vector<16x128xf32>
    %17 = math.log1p %16 : vector<16x128xf32>
    %18 = arith.addf %7, %17 : vector<16x128xf32>
    %19 = arith.select %10, %12, %18 : vector<16x128xi1>, vector<16x128xf32>
    %20 = tpu.reciprocal %19 {approx = true} : vector<16x128xf32> -> vector<16x128xf32>
    %21 = arith.subf %3, %4 : vector<16x128xf32>
    %22 = arith.mulf %21, %20 : vector<16x128xf32>
    %cst_7 = arith.constant 0.707106769 : f32
    %23 = vector.broadcast %cst_7 : f32 to vector<16x128xf32>
    %24 = arith.mulf %22, %23 : vector<16x128xf32>
    %25 = arith.mulf %24, %24 : vector<16x128xf32>
    %cst_8 = arith.constant 0.000000e+00 : f32
    %26 = vector.broadcast %cst_8 : f32 to vector<16x128xf32>
    %27 = arith.subf %26, %25 : vector<16x128xf32>
    %28 = math.exp %27 : vector<16x128xf32>
    %29 = math.erf %24 : vector<16x128xf32>
    %30 = arith.mulf %22, %29 : vector<16x128xf32>
    %cst_9 = arith.constant 0.797884583 : f32
    %31 = vector.broadcast %cst_9 : f32 to vector<16x128xf32>
    %32 = arith.mulf %31, %28 : vector<16x128xf32>
    %33 = arith.addf %30, %32 : vector<16x128xf32>
    %cst_10 = arith.constant 0.564189613 : f32
    %34 = vector.broadcast %cst_10 : f32 to vector<16x128xf32>
    %35 = arith.subf %33, %34 : vector<16x128xf32>
    %36 = arith.mulf %19, %35 : vector<16x128xf32>
    %c1_i32 = arith.constant 1 : i32
    %37 = arith.muli %arg0, %c1_i32 : i32
    %38 = arith.addi %37, %arg1 : i32
    %c16_i32 = arith.constant 16 : i32
    %39 = arith.muli %38, %c16_i32 : i32
    %c16_i32_11 = arith.constant 16 : i32
    %40 = arith.addi %39, %c16_i32_11 : i32
    %c16_i32_12 = arith.constant 16 : i32
    %41 = arith.cmpi sle, %40, %c16_i32_12 : i32
    %42 = arith.extui %41 : i1 to i32
    %c0_i32_13 = arith.constant 0 : i32
    %43 = arith.cmpi ne, %42, %c0_i32_13 : i32
    scf.if %43 {
      %c0_17 = arith.constant 0 : index
      %c0_18 = arith.constant 0 : index
      %50 = vector.load %arg6[%c0_17, %c0_18] : memref<16x128xf32, #tpu.memory_space<vmem>>, vector<16x128xf32>
      %51 = arith.addf %50, %36 : vector<16x128xf32>
      %c0_19 = arith.constant 0 : index
      %c0_20 = arith.constant 0 : index
      %52 = vector.load %arg6[%c0_19, %c0_20] : memref<16x128xf32, #tpu.memory_space<vmem>>, vector<16x128xf32>
      tpu.vector_store %arg6[%c0_19, %c0_20], %51 {strides = array<i32>} : memref<16x128xf32, #tpu.memory_space<vmem>>, vector<16x128xf32>,
    } else {
    }
    %true = arith.constant true
    %44 = arith.xori %41, %true : i1
    %45 = arith.extui %44 : i1 to i32
    %c0_i32_14 = arith.constant 0 : i32
    %46 = arith.cmpi ne, %45, %c0_i32_14 : i32
    scf.if %46 {
      %50 = tpu.iota {dimensions = array<i32: 0>} : vector<16x128xi32>
      %51 = vector.broadcast %39 : i32 to vector<16x128xi32>
      %52 = arith.addi %51, %50 : vector<16x128xi32>
      %c16_i32_17 = arith.constant 16 : i32
      %53 = vector.broadcast %c16_i32_17 : i32 to vector<16x128xi32>
      %54 = arith.cmpi slt, %52, %53 : vector<16x128xi32>
      %c0_18 = arith.constant 0 : index
      %c0_19 = arith.constant 0 : index
      %55 = vector.load %arg6[%c0_18, %c0_19] : memref<16x128xf32, #tpu.memory_space<vmem>>, vector<16x128xf32>
      %cst_20 = arith.constant 0.000000e+00 : f32
      %56 = vector.broadcast %cst_20 : f32 to vector<16x128xf32>
      %57 = arith.select %54, %36, %56 : vector<16x128xi1>, vector<16x128xf32>
      %58 = arith.addf %55, %57 : vector<16x128xf32>
      %c0_21 = arith.constant 0 : index
      %c0_22 = arith.constant 0 : index
      %59 = vector.load %arg6[%c0_21, %c0_22] : memref<16x128xf32, #tpu.memory_space<vmem>>, vector<16x128xf32>
      tpu.vector_store %arg6[%c0_21, %c0_22], %58 {strides = array<i32>} : memref<16x128xf32, #tpu.memory_space<vmem>>, vector<16x128xf32>,
    } else {
    }
    %c0_i32_15 = arith.constant 0 : i32
    %47 = arith.cmpi eq, %arg1, %c0_i32_15 : i32
    %48 = arith.extui %47 : i1 to i32
    %c0_i32_16 = arith.constant 0 : i32
    %49 = arith.cmpi ne, %48, %c0_i32_16 : i32
    scf.if %49 {
      %c0_17 = arith.constant 0 : index
      %c0_18 = arith.constant 0 : index
      %50 = vector.load %arg6[%c0_17, %c0_18] : memref<16x128xf32, #tpu.memory_space<vmem>>, vector<8x128xf32>
      %c8 = arith.constant 8 : index
      %c0_19 = arith.constant 0 : index
      %51 = vector.load %arg6[%c8, %c0_19] : memref<16x128xf32, #tpu.memory_space<vmem>>, vector<8x128xf32>
      %52 = arith.addf %50, %51 : vector<8x128xf32>
      %c0_20 = arith.constant 0 : index
      %c0_21 = arith.constant 0 : index
      %c0_22 = arith.constant 0 : index
      %53 = vector.load %arg5[%c0_20, %c0_21, %c0_22] : memref<1x8x128xf32, #tpu.memory_space<vmem>>, vector<1x8x128xf32>
      %54 = vector.shape_cast %53 : vector<1x8x128xf32> to vector<8x128xf32>
      %55 = vector.shape_cast %52 : vector<8x128xf32> to vector<1x8x128xf32>
      tpu.vector_store %arg5[%c0_20, %c0_21, %c0_22], %55 {strides = array<i32>} : memref<1x8x128xf32, #tpu.memory_space<vmem>>, vector<1x8x128xf32>,
    } else {
    }
    return
  }
  func.func @transform_0(%arg0: i32, %arg1: i32) -> (i32, i32) {
    %c1_i32 = arith.constant 1 : i32
    %0 = arith.muli %arg0, %c1_i32 : i32
    %1 = arith.addi %0, %arg1 : i32
    %c0_i32 = arith.constant 0 : i32
    %2 = arith.minsi %1, %c0_i32 : i32
    %c0_i32_0 = arith.constant 0 : i32
    %c0_i32_1 = arith.constant 0 : i32
    return %2, %c0_i32_0 : i32, i32
  }
  func.func @transform_1(%arg0: i32, %arg1: i32) -> (i32, i32) {
    %c1_i32 = arith.constant 1 : i32
    %0 = arith.muli %arg0, %c1_i32 : i32
    %1 = arith.addi %0, %arg1 : i32
    %c0_i32 = arith.constant 0 : i32
    %2 = arith.minsi %1, %c0_i32 : i32
    %c0_i32_0 = arith.constant 0 : i32
    %c0_i32_1 = arith.constant 0 : i32
    return %2, %c0_i32_0 : i32, i32
  }
  func.func @transform_2(%arg0: i32, %arg1: i32) -> (i32, i32) {
    %c1_i32 = arith.constant 1 : i32
    %0 = arith.muli %arg0, %c1_i32 : i32
    %1 = arith.addi %0, %arg1 : i32
    %c0_i32 = arith.constant 0 : i32
    %2 = arith.minsi %1, %c0_i32 : i32
    %c0_i32_0 = arith.constant 0 : i32
    %c0_i32_1 = arith.constant 0 : i32
    return %2, %c0_i32_0 : i32, i32
  }
  func.func @transform_3(%arg0: i32, %arg1: i32) -> (i32, i32, i32) {
    %c0_i32 = arith.constant 0 : i32
    %c0_i32_0 = arith.constant 0 : i32
    %c0_i32_1 = arith.constant 0 : i32
    return %arg0, %c0_i32, %c0_i32_0 : i32, i32, i32
  }
}

</mosaic_0001>

<bundles_post_ra>
// kernel: normal_crps.1
= control target key start
LH: loop header
LB: loop body
LE: loop exit
PB: predicated region body
PF: predicated region fallthrough
CT: control target
= control target key end

     0   :  { %s311_s2 = inlined_call_operand.vmem [shape: f32[16,128], index: 2, kind: input, shape index: {}]   ;;  %s312_s0 = inlined_call_operand.vmem [shape: f32[16,128], index: 0, kind: input, shape index: {}]   ;;  %s313_s1 = inlined_call_operand.vmem [shape: f32[16,128], index: 1, kind: input, shape index: {}]   ;;  %s314_s3 = inlined_call_operand.vmem [shape: f32[1,8,128], index: 3, kind: output, shape index: {}]  }
   0x1   :  { %v120_v0 = vld [vmem:[%s311_s2] sm:$0xff]  ;;  %v121_v1 = vld [vmem:[%s311_s2 + $0x8] sm:$0xff] }
   0x2   :  { %v128_v2 = vand.u32 2147483647, %v120_v0  ;;  %v129_v3 = vand.u32 2147483647, %v121_v1  ;;  %v122_v20 = vmax.f32 %v120_v0, 0.0  ;;  %v123_v23 = vmax.f32 %v121_v1, 0.0 }
   0x3   :  { %vm124_vm2 = vcmp.ne.f32.partialorder %v120_v0, %v120_v0  ;;  %vm125_vm3 = vcmp.ne.f32.partialorder %v121_v1, %v121_v1  ;;  %v116_v32 = vld [vmem:[%s312_s0] sm:$0xff]  ;;  %v117_v34 = vld [vmem:[%s312_s0 + $0x8] sm:$0xff] }
   0x4   :  { %v130_v4 = vsub.f32 0.0, %v128_v2  ;;  %v131_v5 = vsub.f32 0.0, %v129_v3  ;;  %v118_v33 = vld [vmem:[%s313_s1] sm:$0xff]  ;;  %v119_v35 = vld [vmem:[%s313_s1 + $0x8] sm:$0xff] }
   0x5   :  { %v160_v36 = vsub.f32 %v116_v32, %v118_v33  ;;  %v161_v37 = vsub.f32 %v117_v34, %v119_v35 }
   0x6   :  { %v132_v6 = vmul.f32 1.442695, %v130_v4  ;;  %v134_v7 = vmul.f32 1.442695, %v131_v5 }
   0x8   :  { %250 = vpow2.f32 %v132_v6 }
   0x9   :  { %252 = vpow2.f32 %v134_v7 }
  0x12   :  { %v251_v8 = vpop.eup %250 }
  0x13   :  { %v253_v9 = vpop.eup %252  ;;  %v136_v10 = vadd.f32 1.0, %v251_v8  ;;  %v139_v12 = vmul.f32 -0.5, %v251_v8  ;;  %v142_v15 = vand.u32 2147483647, %v251_v8 }
  0x14   :  { %v145_v11 = vadd.f32 1.0, %v253_v9  ;;  %v148_v13 = vmul.f32 -0.5, %v253_v9  ;;  %v151_v17 = vand.u32 2147483647, %v253_v9 }
  0x15   :  { %254 = vlog2.f32 %v136_v10  ;;  %v140_v14 = vadd.f32 1.0, %v139_v12  ;;  %vm143_vm0 = vcmp.lt.f32.partialorder %v142_v15, 0.0004427343 }
  0x16   :  { %256 = vlog2.f32 %v145_v11  ;;  %v149_v16 = vadd.f32 1.0, %v148_v13  ;;  %vm152_vm1 = vcmp.lt.f32.partialorder %v151_v17, 0.0004427343 }
  0x17   :  { %v141_v18 = vmul.f32 %v251_v8, %v140_v14 }
  0x18   :  { %v150_v21 = vmul.f32 %v253_v9, %v149_v16 }
  0x1f   :  { %v255_v19 = vpop.eup %254 }
  0x20   :  { %v257_v22 = vpop.eup %256  ;;  %v138_v24 = vmul.f32 0.6931472, %v255_v19 }
  0x21   :  { %v147_v25 = vmul.f32 0.6931472, %v257_v22 }
  0x22   :  { %v144_v26 = vsel %vm143_vm0, %v141_v18, %v138_v24 }
  0x23   :  { %v153_v27 = vsel %vm152_vm1, %v150_v21, %v147_v25  ;;  %v154_v28 = vadd.f32 %v144_v26, %v122_v20 }
  0x24   :  { %v155_v29 = vadd.f32 %v153_v27, %v123_v23 }
  0x25   :  { %v156_v30 = vsel %vm124_vm2, %v120_v0, %v154_v28 }
  0x26   :  { %v157_v31 = vsel %vm125_vm3, %v121_v1, %v155_v29  ;;  %258 = vrcp.f32 %v156_v30 }
  0x27   :  { %260 = vrcp.f32 %v157_v31 }
  0x30   :  { %v259_v38 = vpop.eup %258 }
  0x31   :  { %v261_v39 = vpop.eup %260  ;;  %v162_v40 = vmul.f32 %v259_v38, %v160_v36 }
  0x32   :  { %v163_v41 = vmul.f32 %v261_v39, %v161_v37 }
  0x33   :  { %v164_v42 = vmul.f32 0.70710677, %v162_v40 }
  0x34   :  { %v165_v43 = vmul.f32 0.70710677, %v163_v41 }
  0x35   :  { %v166_v44 = vmul.f32 %v164_v42, %v164_v42  ;;  %262 = verf.f32 %v164_v42 }
  0x36   :  { %v167_v45 = vmul.f32 %v165_v43, %v165_v43  ;;  %264 = verf.f32 %v165_v43 }
  0x37   :  { %v168_v46 = vsub.f32 0.0, %v166_v44 }
  0x38   :  { %v169_v47 = vsub.f32 0.0, %v167_v45 }
  0x39   :  { %v170_v48 = vmul.f32 1.442695, %v168_v46 }
  0x3a   :  { %v172_v49 = vmul.f32 1.442695, %v169_v47 }
  0x3b   :  { %266 = vpow2.f32 %v170_v48 }
  0x3c   :  { %268 = vpow2.f32 %v172_v49 }
  0x3f   :  { %v263_v50 = vpop.eup %262 }
  0x40   :  { %v265_v51 = vpop.eup %264  ;;  %v176_v52 = vmul.f32 %v263_v50, %v162_v40 }
  0x41   :  { %v177_v54 = vmul.f32 %v265_v51, %v163_v41 }
  0x45   :  { %v267_v53 = vpop.eup %266 }
  0x46   :  { %v269_v55 = vpop.eup %268  ;;  %v178_v56 = vmul.f32 0.7978846, %v267_v53 }
  0x47   :  { %v179_v57 = vmul.f32 0.7978846, %v269_v55 }
  0x48   :  { %v180_v58 = vadd.f32 %v178_v56, %v176_v52 }
  0x49   :  { %v181_v59 = vadd.f32 %v179_v57, %v177_v54 }
  0x4a   :  { %v248_v60 = vadd.f32 -0.5641896, %v180_v58 }
  0x4b   :  { %v249_v61 = vadd.f32 -0.5641896, %v181_v59 }
  0x4c   :  { %v184_v62 = vmul.f32 %v248_v60, %v156_v30 }
  0x4d   :  { %v185_v63 = vmul.f32 %v249_v61, %v157_v31 }
  0x4f   :  { %v224_v0 = vadd.f32 %v185_v63, %v184_v62 }
  0x51   :  { %225 = vst [vmem:[%s314_s3] sm:$0xff] %v224_v0 }

</bundles_post_ra>
